<compile_context>
chip_gen: v5e
topology: v5e:2x2
jax: 0.10.0
libtpu: 0.0.40
codegen_flags: <defaults>
</compile_context>

<pallas_src>
import jax
import jax.numpy as jnp
from jax.experimental import pallas as pl
from jax.experimental.pallas import tpu as pltpu


def _round_up(a, b):
    return (a + b - 1) // b * b


def _atom_embedding_kernel(idx_ref, tbl_ref, out_ref):
    # idx_ref: (TN, 1) int32, tbl_ref: (V, D), out_ref: (TN, D)
    idx = idx_ref[...]                                      # (TN, 1)
    tn = idx.shape[0]
    v = tbl_ref.shape[0]
    # one-hot(idx) @ table == embedding lookup (exact: 0/1 selects)
    iota = jax.lax.broadcasted_iota(jnp.int32, (tn, v), 1)
    onehot = (iota == idx).astype(tbl_ref.dtype)            # (TN, V)
    out_ref[...] = jnp.dot(
        onehot, tbl_ref[...], preferred_element_type=jnp.float32
    ).astype(out_ref.dtype)


def atom_embedding(x, entity, table, *, separate_entity_embedding=False, tn=1024):
    """x: (N,) int indices; entity: (N,) int in {0,1}; table: (V, D) float."""
    n = x.shape[0]
    v, d = table.shape

    # Fold the entity offset into a single precomputed int32 index array.
    if separate_entity_embedding:
        idx = x.astype(jnp.int32) * 2 + entity.astype(jnp.int32)
    else:
        idx = x.astype(jnp.int32)

    # Tile sizing: big sublane-dense tiles, clamped to the (padded) token
    # count for small inputs; always a multiple of 8 (sublane granularity).
    tn_eff = max(8, min(_round_up(tn, 8), _round_up(n, 8)))
    n_pad = _round_up(n, tn_eff)
    if n_pad != n:
        # Pad with index 0 (a valid table row); pad rows are sliced off below.
        idx = jnp.pad(idx, (0, n_pad - n))
    idx2 = idx.reshape(n_pad, 1)

    out = pl.pallas_call(
        _atom_embedding_kernel,
        out_shape=jax.ShapeDtypeStruct((n_pad, d), table.dtype),
        grid_spec=pltpu.PrefetchScalarGridSpec(
            num_scalar_prefetch=0,
            grid=(n_pad // tn_eff,),
            in_specs=[
                pl.BlockSpec((tn_eff, 1), lambda i: (i, 0)),  # index tile
                pl.BlockSpec((v, d), lambda i: (0, 0)),       # resident table
            ],
            out_specs=pl.BlockSpec((tn_eff, d), lambda i: (i, 0)),
        ),
        compiler_params=pltpu.CompilerParams(
            dimension_semantics=("parallel",),  # megacore-shard token tiles
        ),
    )(idx2, table)

    return out[:n] if n_pad != n else out


def reference_embedding(x, entity, table, *, separate_entity_embedding=False):
    if separate_entity_embedding:
        idx = x * 2 + entity
    else:
        idx = x
    return jnp.take(table, idx, axis=0)


if __name__ == "__main__":
    num_atoms = 16
    embedding_dim = 128
    n_tokens = 16

    key = jax.random.PRNGKey(0)
    k_x, k_ent, k_tbl1, k_tbl2, k_x2, k_ent2 = jax.random.split(key, 6)

    # Synthetic "data.x" (atom type indices) and "data.entity" (0=protein, 1=ligand)
    x = jax.random.randint(k_x, (n_tokens,), 0, num_atoms, dtype=jnp.int32)
    entity = jax.random.randint(k_ent, (n_tokens,), 0, 2, dtype=jnp.int32)

    # nn.Embedding default init: N(0, 1)
    table_shared = jax.random.normal(k_tbl1, (num_atoms, embedding_dim), jnp.float32)
    table_separate = jax.random.normal(
        k_tbl2, (num_atoms * 2, embedding_dim), jnp.float32
    )

    # Case 1: separate_entity_embedding=False
    out1 = atom_embedding(x, entity, table_shared, separate_entity_embedding=False)
    out1 = jax.block_until_ready(out1)
    ref1 = reference_embedding(x, entity, table_shared, separate_entity_embedding=False)
    assert out1.shape == (n_tokens, embedding_dim)
    assert jnp.allclose(out1, ref1, atol=1e-6), "mismatch (shared embedding)"

    # Case 2: separate_entity_embedding=True
    out2 = atom_embedding(x, entity, table_separate, separate_entity_embedding=True)
    out2 = jax.block_until_ready(out2)
    ref2 = reference_embedding(x, entity, table_separate, separate_entity_embedding=True)
    assert out2.shape == (n_tokens, embedding_dim)
    assert jnp.allclose(out2, ref2, atol=1e-6), "mismatch (separate entity embedding)"

    # Case 3: non-multiple token count + multi-step grid (exercises padding path)
    n3 = 37
    x3 = jax.random.randint(k_x2, (n3,), 0, num_atoms, dtype=jnp.int32)
    ent3 = jax.random.randint(k_ent2, (n3,), 0, 2, dtype=jnp.int32)
    out3 = atom_embedding(
        x3, ent3, table_separate, separate_entity_embedding=True, tn=16
    )
    out3 = jax.block_until_ready(out3)
    ref3 = reference_embedding(x3, ent3, table_separate, separate_entity_embedding=True)
    assert out3.shape == (n3, embedding_dim)
    assert jnp.allclose(out3, ref3, atol=1e-6), "mismatch (padded / multi-tile)"

    print("KERNEL_OK")
</pallas_src>

<mosaic_0001>
module attributes {stable_mosaic.version = 11 : i64} {
  func.func @_atom_embedding_kernel(%arg0: i32, %arg1: memref<16x1xi32, #tpu.memory_space<vmem>>, %arg2: memref<16x128xf32, #tpu.memory_space<vmem>>, %arg3: memref<16x128xf32, #tpu.memory_space<vmem>>) attributes {dimension_semantics = [#tpu.dimension_semantics<parallel>], iteration_bounds = array<i64: 1>, scalar_prefetch = 0 : i64, scratch_operands = 0 : i64, tpu.core_type = #tpu.core_type<tc>, window_params = [{transform_indices = @transform_0, window_bounds = array<i64: 16, 1>}, {pipeline_mode = #tpu.pipeline_mode<synchronous>, transform_indices = @transform_1, window_bounds = array<i64: 16, 128>}, {transform_indices = @transform_2, window_bounds = array<i64: 16, 128>}]} {
    %c0 = arith.constant 0 : index
    %c0_0 = arith.constant 0 : index
    %0 = vector.load %arg1[%c0, %c0_0] : memref<16x1xi32, #tpu.memory_space<vmem>>, vector<16x1xi32>
    %1 = tpu.iota {dimensions = array<i32: 1>} : vector<16x16xi32>
    %2 = vector.broadcast %0 : vector<16x1xi32> to vector<16x16xi32>
    %3 = arith.cmpi eq, %1, %2 : vector<16x16xi32>
    %4 = arith.extui %3 : vector<16x16xi1> to vector<16x16xi32>
    %5 = arith.sitofp %4 : vector<16x16xi32> to vector<16x16xf32>
    %c0_1 = arith.constant 0 : index
    %c0_2 = arith.constant 0 : index
    %6 = vector.load %arg2[%c0_1, %c0_2] : memref<16x128xf32, #tpu.memory_space<vmem>>, vector<16x128xf32>
    %cst = arith.constant dense<0.000000e+00> : vector<16x128xf32>
    %7 = tpu.matmul %5, %6, %cst {dimension_numbers = #tpu.dot_dimension_numbers<[1], [0], [0], [1], [0, 0, 1, 1], [], []>} : vector<16x16xf32>, vector<16x128xf32>, vector<16x128xf32> -> vector<16x128xf32>
    %c0_3 = arith.constant 0 : index
    %c0_4 = arith.constant 0 : index
    %8 = vector.load %arg3[%c0_3, %c0_4] : memref<16x128xf32, #tpu.memory_space<vmem>>, vector<16x128xf32>
    tpu.vector_store %arg3[%c0_3, %c0_4], %7 {strides = array<i32>} : memref<16x128xf32, #tpu.memory_space<vmem>>, vector<16x128xf32>,
    return
  }
  func.func @transform_0(%arg0: i32) -> (i32, i32) {
    %c0_i32 = arith.constant 0 : i32
    %c0_i32_0 = arith.constant 0 : i32
    return %arg0, %c0_i32 : i32, i32
  }
  func.func @transform_1(%arg0: i32) -> (i32, i32) {
    %c0_i32 = arith.constant 0 : i32
    %c0_i32_0 = arith.constant 0 : i32
    %c0_i32_1 = arith.constant 0 : i32
    return %c0_i32, %c0_i32_0 : i32, i32
  }
  func.func @transform_2(%arg0: i32) -> (i32, i32) {
    %c0_i32 = arith.constant 0 : i32
    %c0_i32_0 = arith.constant 0 : i32
    return %arg0, %c0_i32 : i32, i32
  }
}

</mosaic_0001>

<bundles_post_ra>
// kernel: tpu_custom_call.1
= control target key start
LH: loop header
LB: loop body
LE: loop exit
PB: predicated region body
PF: predicated region fallthrough
CT: control target
= control target key end

     0   :  { %v118_v2 = vmov 0   ;;  %s153_s0 = inlined_call_operand.vmem [shape: s32[16,1], index: 0, kind: input, shape index: {}]   ;;  %s154_s1 = inlined_call_operand.vmem [shape: f32[16,128], index: 1, kind: input, shape index: {}]   ;;  %s155_s2 = inlined_call_operand.hbm [shape: f32[16,128], index: 2, kind: output, shape index: {}]  }
   0x1   :  { %v12_v0 = vld [vmem:[%s153_s0] sm:$0xff]  ;;  %v29_v1 = vld [vmem:[%s154_s1 + $0x8] sm:$0xff]  ;;  %91 = vset.pattern.permute.xlu0 %v118_v2 }
   0x2   :  { %51 = vmatpush.msra.mxu0 %v29_v1 }
   0x3   :  { %7 = vsyncpa [#allocation3], 0  ;;  %17 = vperm.xlu0 %91, %v12_v0   ;;  %84 = vmatpush.msra.mxu1 %v29_v1  ;;  %v13_v3 = vld [vmem:[%s153_s0 + $0x8] sm:$0xff]  ;;  %v28_v4 = vld [vmem:[%s154_s1] sm:$0xff]  ;;  %v14_v5 = vlaneseq  ;;  %vm30_vm0 = vcmask 130048   ;;  %v119_v8 = vmov 0.0  }
   0x4   :  { %52 = vmatpush.msra.mxu0 %v28_v4  ;;  %s120_s0 = smov [#allocation2]   ;;  %s68_s19 = sshll.u32 %s155_s2, 4  ;;  %s69_s19 = int_to_ptr.hbm [resolvable:$true] %s68_s19 }
   0x5   :  { %85 = vmatpush.msra.mxu1 %v28_v4  ;;  %v15_v6 = vand.u32 127, %v14_v5  ;;  %s66_s17 = sshll.u32 %s120_s0, 4  ;;  %s121_s20 = smov 128   ;;  %s67_s17 = int_to_ptr.vmem [resolvable:$true] %s66_s17 }
   0x6   :  { %s122_s21 = smov 8  }
   0xb   :  { %20 = vperm.xlu0 %91, %v13_v3  }
  0x75   :  { %v18_v7 = vpop.permute.xlu0 %17 }
  0x76   :  { %vm22_vm1 = vcmp.eq.s32.totalorder %v15_v6, %v18_v7 }
  0x77   :  { %v80_v9 = vsel %vm22_vm1, 1.0, %v119_v8 }
  0x78   :  { %82 = vmatmul.msk.f32.vlgmr.msra.gmra.mxu0 %vm30_vm0, %v80_v9 }
  0x7d   :  { %v21_v10 = vpop.permute.xlu0 %20 }
  0x7e   :  { %vm23_vm2 = vcmp.eq.s32.totalorder %v15_v6, %v21_v10 }
  0x7f   :  { %v81_v11 = vsel %vm23_vm2, 1.0, %v119_v8 }
  0x80   :  { %83 = vmatmul.msk.f32.vlgmr.msra.gmra.mxu1 %vm30_vm0, %v81_v11 }
  0xf5   :  { %v54_v12 = vpop.f32.mrf.mxu0 }
  0xf6   :  { %60 = vst [vmem:[#allocation2] sm:$0xff] %v54_v12 }
  0xfd   :  { %v57_v13 = vpop.f32.mrf.mxu1 }
  0xfe   :  { %61 = vst [vmem:[#allocation2 + $0x8] sm:$0xff] %v57_v13 }
  0xff   :  { %74 = dma.vmem_to_hbm [thread:$0]  %s67_s17, 256, %s69_s19, [#allocation3], %s121_s20, %s121_s20, %s122_s21  }
 0x100   :  { %116 = dma.done.wait [#allocation3], 256  }
 0x101   :  { %117 = vsyncadd [#allocation3], 4294967040 }
 0x102   :  { %79 = vsyncpa [#allocation3], 1 }

</bundles_post_ra>
